<compile_context>
chip_gen: v7x
topology: tpu7x:2x2x1
jax: 0.10.0
libtpu: 0.0.40
codegen_flags: <defaults>
</compile_context>

<pallas_src>
import functools

import jax
import jax.numpy as jnp
from jax.experimental import pallas as pl
from jax.experimental.pallas import tpu as pltpu


def _knn_kernel(support_ref, query_ref, vals_ref, idx_ref, *, k):
    # support_ref: (1, N, C), query_ref: (1, TM, C) -- one (batch, query-tile) per step.
    s = support_ref[0]                                   # [N, C]   native dtype (bf16 ok for MXU)
    q = query_ref[0]                                     # [TM, C]
    N = s.shape[0]

    s32 = s.astype(jnp.float32)
    q32 = q.astype(jnp.float32)

    # -2 q.s term: contract over C directly (no transpose of either operand).
    # Result [N, TM]: support points on sublanes, query points on lanes.
    dots = jax.lax.dot_general(
        s, q,
        dimension_numbers=(((1,), (1,)), ((), ())),
        preferred_element_type=jnp.float32,
    )                                                    # [N, TM]

    s_sq = jnp.sum(s32 * s32, axis=-1, keepdims=True)    # [N, 1]
    # ||q||^2 is a per-column constant: only needed for the K selected values.
    q_sq = jnp.sum(q32 * q32, axis=-1)[None, :]          # [1, TM] lane vector

    # Selection runs on d^2 - ||q||^2 (same ordering, fewer full-matrix passes).
    partial = s_sq - 2.0 * dots                          # [N, TM]

    row_ids = jax.lax.broadcasted_iota(jnp.int32, (N, 1), 0)   # [N, 1]

    # K is small & static: unrolled iterative argmin with masking
    # (top-k smallest, sorted; ties broken by lowest support index).
    for kk in range(k):
        minv = jnp.min(partial, axis=0, keepdims=True)                        # [1, TM]
        is_min = partial <= minv                                              # [N, TM]
        midx = jnp.min(jnp.where(is_min, row_ids, N), axis=0, keepdims=True)  # [1, TM] int32
        # mask out the selected support row (per query column) for the next round
        partial = jnp.where(row_ids == midx, jnp.inf, partial)

        # sqrt only on the selected values, just before the (lane-dense) store.
        d_k = jnp.sqrt(jnp.maximum(minv + q_sq, 0.0))                         # [1, TM]
        vals_ref[0, kk:kk + 1, :] = d_k.astype(vals_ref.dtype)
        idx_ref[0, kk:kk + 1, :] = midx


def _pick_query_tile(m):
    # Lane-dense query tile; conservative size so [N, TM] temporaries fit the
    # default scoped VMEM (incl. v7x's smaller 64 MiB VMEM).  Fall back to the
    # full M when it is small or does not divide evenly.
    if m > 128 and m % 128 == 0:
        return 128
    return m


def knn(support, query, neighbors):
    """support: [B, N, C], query: [B, M, C] -> (values [B, K, M], indices [B, M, K] int32)."""
    B, N, C = support.shape
    Bq, M, Cq = query.shape
    assert B == Bq and C == Cq
    K = neighbors
    assert K <= N, "neighbors must be <= number of support points"

    TM = _pick_query_tile(M)
    num_m = M // TM

    out_shape = (
        jax.ShapeDtypeStruct((B, K, M), support.dtype),  # values, [B, K, M]
        jax.ShapeDtypeStruct((B, K, M), jnp.int32),      # indices, lane-dense [B, K, M]
    )

    vals, idx_km = pl.pallas_call(
        functools.partial(_knn_kernel, k=K),
        out_shape=out_shape,
        grid=(B, num_m),
        in_specs=[
            # support stays resident across the inner (query-tile) axis
            pl.BlockSpec((1, N, C), lambda b, m: (b, 0, 0)),
            pl.BlockSpec((1, TM, C), lambda b, m: (b, m, 0)),
        ],
        out_specs=(
            pl.BlockSpec((1, K, TM), lambda b, m: (b, 0, m)),
            pl.BlockSpec((1, K, TM), lambda b, m: (b, 0, m)),
        ),
        compiler_params=pltpu.CompilerParams(
            dimension_semantics=("parallel", "parallel"),
        ),
    )(support, query)

    # PyTorch returns indices transposed to [B, M, K]; do it outside the kernel
    # so the in-kernel store stays lane-dense.
    idx = jnp.transpose(idx_km, (0, 2, 1)).astype(jnp.int32)
    return vals, idx


def _knn_ref(support, query, k):
    # pure-JAX reference (same math) for a sanity check
    d2 = (
        jnp.sum(support**2, -1)[:, :, None]
        + jnp.sum(query**2, -1)[:, None, :]
        - 2.0 * jnp.einsum("bnc,bmc->bnm", support, query)
    )
    d = jnp.sqrt(jnp.maximum(d2, 0.0))          # [B, N, M]
    vals = jnp.sort(d, axis=1)[:, :k, :]        # [B, K, M]
    return d, vals


def _check(support, query, K):
    vals, idx = knn(support, query, K)
    jax.block_until_ready((vals, idx))
    B, N, C = support.shape
    _, M, _ = query.shape
    assert vals.shape == (B, K, M) and vals.dtype == support.dtype
    assert idx.shape == (B, M, K) and idx.dtype == jnp.int32

    d_full, vals_ref = _knn_ref(support, query, K)
    assert jnp.allclose(vals, vals_ref, atol=1e-4), "top-k distance values mismatch"
    # indices must point at support rows whose distance equals the returned value
    gathered = jnp.take_along_axis(jnp.transpose(d_full, (0, 2, 1)), idx, axis=-1)  # [B, M, K]
    assert jnp.allclose(gathered, jnp.transpose(vals, (0, 2, 1)), atol=1e-4), "indices mismatch"


if __name__ == "__main__":
    key = jax.random.PRNGKey(0)
    k1, k2, k3, k4 = jax.random.split(key, 4)

    # Small shape (single query tile per batch element).
    B, N, M, C, K = 2, 16, 8, 4, 4
    support = jax.random.normal(k1, (B, N, C), dtype=jnp.float32)
    query = jax.random.normal(k2, (B, M, C), dtype=jnp.float32)
    _check(support, query, K)

    # Slightly larger shape exercising the tiled-M grid (grid=(B, M//128)).
    B2, N2, M2, C2, K2 = 2, 64, 256, 3, 8
    support2 = jax.random.normal(k3, (B2, N2, C2), dtype=jnp.float32)
    query2 = jax.random.normal(k4, (B2, M2, C2), dtype=jnp.float32)
    _check(support2, query2, K2)

    print("KERNEL_OK")
</pallas_src>

<mosaic_0001>
module attributes {stable_mosaic.version = 11 : i64} {
  func.func @_knn_kernel(%arg0: i32, %arg1: i32, %arg2: memref<1x16x4xf32, #tpu.memory_space<vmem>>, %arg3: memref<1x8x4xf32, #tpu.memory_space<vmem>>, %arg4: memref<1x4x8xf32, #tpu.memory_space<vmem>>, %arg5: memref<1x4x8xi32, #tpu.memory_space<vmem>>) attributes {dimension_semantics = [#tpu.dimension_semantics<parallel>, #tpu.dimension_semantics<parallel>], iteration_bounds = array<i64: 2, 1>, scalar_prefetch = 0 : i64, scratch_operands = 0 : i64, tpu.core_type = #tpu.core_type<tc>, window_params = [{transform_indices = @transform_0, window_bounds = array<i64: 1, 16, 4>}, {transform_indices = @transform_1, window_bounds = array<i64: 1, 8, 4>}, {transform_indices = @transform_2, window_bounds = array<i64: 1, 4, 8>}, {transform_indices = @transform_3, window_bounds = array<i64: 1, 4, 8>}]} {
    %c0 = arith.constant 0 : index
    %c0_0 = arith.constant 0 : index
    %c0_1 = arith.constant 0 : index
    %0 = vector.load %arg2[%c0, %c0_0, %c0_1] : memref<1x16x4xf32, #tpu.memory_space<vmem>>, vector<1x16x4xf32>
    %1 = vector.shape_cast %0 : vector<1x16x4xf32> to vector<16x4xf32>
    %c0_2 = arith.constant 0 : index
    %c0_3 = arith.constant 0 : index
    %c0_4 = arith.constant 0 : index
    %2 = vector.load %arg3[%c0_2, %c0_3, %c0_4] : memref<1x8x4xf32, #tpu.memory_space<vmem>>, vector<1x8x4xf32>
    %3 = vector.shape_cast %2 : vector<1x8x4xf32> to vector<8x4xf32>
    %cst = arith.constant dense<0.000000e+00> : vector<16x8xf32>
    %4 = tpu.matmul %1, %3, %cst {dimension_numbers = #tpu.dot_dimension_numbers<[1], [1], [0], [0], [0, 0, 1, 0], [], []>} : vector<16x4xf32>, vector<8x4xf32>, vector<16x8xf32> -> vector<16x8xf32>
    %5 = arith.mulf %1, %1 : vector<16x4xf32>
    %cst_5 = arith.constant dense<0.000000e+00> : vector<16xf32>
    %6 = vector.multi_reduction <add>, %5, %cst_5 [1] : vector<16x4xf32> to vector<16xf32>
    %7 = vector.shape_cast %6 : vector<16xf32> to vector<16x1xf32>
    %8 = arith.mulf %3, %3 : vector<8x4xf32>
    %cst_6 = arith.constant dense<0.000000e+00> : vector<8xf32>
    %9 = vector.multi_reduction <add>, %8, %cst_6 [1] : vector<8x4xf32> to vector<8xf32>
    %10 = vector.shape_cast %9 : vector<8xf32> to vector<1x8xf32>
    %cst_7 = arith.constant 2.000000e+00 : f32
    %11 = vector.broadcast %cst_7 : f32 to vector<16x8xf32>
    %12 = arith.mulf %11, %4 : vector<16x8xf32>
    %13 = vector.broadcast %7 : vector<16x1xf32> to vector<16x8xf32>
    %14 = arith.subf %13, %12 : vector<16x8xf32>
    %15 = tpu.iota {dimensions = array<i32: 0>} : vector<16x1xi32>
    %cst_8 = arith.constant dense<0x7F800000> : vector<8xf32>
    %16 = vector.multi_reduction <minimumf>, %14, %cst_8 [0] : vector<16x8xf32> to vector<8xf32>
    %17 = vector.shape_cast %16 : vector<8xf32> to vector<1x8xf32>
    %18 = vector.broadcast %17 : vector<1x8xf32> to vector<16x8xf32>
    %19 = arith.cmpf ole, %14, %18 : vector<16x8xf32>
    %c16_i32 = arith.constant 16 : i32
    %20 = vector.shape_cast %15 : vector<16x1xi32> to vector<16x1xi32>
    %21 = vector.broadcast %20 : vector<16x1xi32> to vector<16x8xi32>
    %22 = vector.broadcast %c16_i32 : i32 to vector<16x8xi32>
    %23 = arith.select %19, %21, %22 : vector<16x8xi1>, vector<16x8xi32>
    %cst_9 = arith.constant dense<2147483647> : vector<8xi32>
    %24 = vector.multi_reduction <minsi>, %23, %cst_9 [0] : vector<16x8xi32> to vector<8xi32>
    %25 = vector.shape_cast %24 : vector<8xi32> to vector<1x8xi32>
    %26 = vector.broadcast %15 : vector<16x1xi32> to vector<16x8xi32>
    %27 = vector.broadcast %25 : vector<1x8xi32> to vector<16x8xi32>
    %28 = arith.cmpi eq, %26, %27 : vector<16x8xi32>
    %cst_10 = arith.constant 0x7F800000 : f32
    %29 = vector.broadcast %cst_10 : f32 to vector<16x8xf32>
    %30 = arith.select %28, %29, %14 : vector<16x8xi1>, vector<16x8xf32>
    %31 = arith.addf %17, %10 : vector<1x8xf32>
    %cst_11 = arith.constant 0.000000e+00 : f32
    %32 = vector.broadcast %cst_11 : f32 to vector<1x8xf32>
    %33 = arith.maximumf %31, %32 : vector<1x8xf32>
    %34 = math.sqrt %33 : vector<1x8xf32>
    %c0_12 = arith.constant 0 : index
    %c0_13 = arith.constant 0 : index
    %c0_14 = arith.constant 0 : index
    %35 = vector.load %arg4[%c0_12, %c0_13, %c0_14] : memref<1x4x8xf32, #tpu.memory_space<vmem>>, vector<1x1x8xf32>
    %36 = vector.shape_cast %35 : vector<1x1x8xf32> to vector<1x8xf32>
    %37 = vector.shape_cast %34 : vector<1x8xf32> to vector<1x1x8xf32>
    tpu.vector_store %arg4[%c0_12, %c0_13, %c0_14], %37 {strides = array<i32>} : memref<1x4x8xf32, #tpu.memory_space<vmem>>, vector<1x1x8xf32>,
    %c0_15 = arith.constant 0 : index
    %c0_16 = arith.constant 0 : index
    %c0_17 = arith.constant 0 : index
    %38 = vector.load %arg5[%c0_15, %c0_16, %c0_17] : memref<1x4x8xi32, #tpu.memory_space<vmem>>, vector<1x1x8xi32>
    %39 = vector.shape_cast %38 : vector<1x1x8xi32> to vector<1x8xi32>
    %40 = vector.shape_cast %25 : vector<1x8xi32> to vector<1x1x8xi32>
    tpu.vector_store %arg5[%c0_15, %c0_16, %c0_17], %40 {strides = array<i32>} : memref<1x4x8xi32, #tpu.memory_space<vmem>>, vector<1x1x8xi32>,
    %cst_18 = arith.constant dense<0x7F800000> : vector<8xf32>
    %41 = vector.multi_reduction <minimumf>, %30, %cst_18 [0] : vector<16x8xf32> to vector<8xf32>
    %42 = vector.shape_cast %41 : vector<8xf32> to vector<1x8xf32>
    %43 = vector.broadcast %42 : vector<1x8xf32> to vector<16x8xf32>
    %44 = arith.cmpf ole, %30, %43 : vector<16x8xf32>
    %c16_i32_19 = arith.constant 16 : i32
    %45 = vector.shape_cast %15 : vector<16x1xi32> to vector<16x1xi32>
    %46 = vector.broadcast %45 : vector<16x1xi32> to vector<16x8xi32>
    %47 = vector.broadcast %c16_i32_19 : i32 to vector<16x8xi32>
    %48 = arith.select %44, %46, %47 : vector<16x8xi1>, vector<16x8xi32>
    %cst_20 = arith.constant dense<2147483647> : vector<8xi32>
    %49 = vector.multi_reduction <minsi>, %48, %cst_20 [0] : vector<16x8xi32> to vector<8xi32>
    %50 = vector.shape_cast %49 : vector<8xi32> to vector<1x8xi32>
    %51 = vector.broadcast %15 : vector<16x1xi32> to vector<16x8xi32>
    %52 = vector.broadcast %50 : vector<1x8xi32> to vector<16x8xi32>
    %53 = arith.cmpi eq, %51, %52 : vector<16x8xi32>
    %cst_21 = arith.constant 0x7F800000 : f32
    %54 = vector.broadcast %cst_21 : f32 to vector<16x8xf32>
    %55 = arith.select %53, %54, %30 : vector<16x8xi1>, vector<16x8xf32>
    %56 = arith.addf %42, %10 : vector<1x8xf32>
    %cst_22 = arith.constant 0.000000e+00 : f32
    %57 = vector.broadcast %cst_22 : f32 to vector<1x8xf32>
    %58 = arith.maximumf %56, %57 : vector<1x8xf32>
    %59 = math.sqrt %58 : vector<1x8xf32>
    %c0_23 = arith.constant 0 : index
    %c1 = arith.constant 1 : index
    %c0_24 = arith.constant 0 : index
    %60 = vector.load %arg4[%c0_23, %c1, %c0_24] : memref<1x4x8xf32, #tpu.memory_space<vmem>>, vector<1x1x8xf32>
    %61 = vector.shape_cast %60 : vector<1x1x8xf32> to vector<1x8xf32>
    %62 = vector.shape_cast %59 : vector<1x8xf32> to vector<1x1x8xf32>
    tpu.vector_store %arg4[%c0_23, %c1, %c0_24], %62 {strides = array<i32>} : memref<1x4x8xf32, #tpu.memory_space<vmem>>, vector<1x1x8xf32>,
    %c0_25 = arith.constant 0 : index
    %c1_26 = arith.constant 1 : index
    %c0_27 = arith.constant 0 : index
    %63 = vector.load %arg5[%c0_25, %c1_26, %c0_27] : memref<1x4x8xi32, #tpu.memory_space<vmem>>, vector<1x1x8xi32>
    %64 = vector.shape_cast %63 : vector<1x1x8xi32> to vector<1x8xi32>
    %65 = vector.shape_cast %50 : vector<1x8xi32> to vector<1x1x8xi32>
    tpu.vector_store %arg5[%c0_25, %c1_26, %c0_27], %65 {strides = array<i32>} : memref<1x4x8xi32, #tpu.memory_space<vmem>>, vector<1x1x8xi32>,
    %cst_28 = arith.constant dense<0x7F800000> : vector<8xf32>
    %66 = vector.multi_reduction <minimumf>, %55, %cst_28 [0] : vector<16x8xf32> to vector<8xf32>
    %67 = vector.shape_cast %66 : vector<8xf32> to vector<1x8xf32>
    %68 = vector.broadcast %67 : vector<1x8xf32> to vector<16x8xf32>
    %69 = arith.cmpf ole, %55, %68 : vector<16x8xf32>
    %c16_i32_29 = arith.constant 16 : i32
    %70 = vector.shape_cast %15 : vector<16x1xi32> to vector<16x1xi32>
    %71 = vector.broadcast %70 : vector<16x1xi32> to vector<16x8xi32>
    %72 = vector.broadcast %c16_i32_29 : i32 to vector<16x8xi32>
    %73 = arith.select %69, %71, %72 : vector<16x8xi1>, vector<16x8xi32>
    %cst_30 = arith.constant dense<2147483647> : vector<8xi32>
    %74 = vector.multi_reduction <minsi>, %73, %cst_30 [0] : vector<16x8xi32> to vector<8xi32>
    %75 = vector.shape_cast %74 : vector<8xi32> to vector<1x8xi32>
    %76 = vector.broadcast %15 : vector<16x1xi32> to vector<16x8xi32>
    %77 = vector.broadcast %75 : vector<1x8xi32> to vector<16x8xi32>
    %78 = arith.cmpi eq, %76, %77 : vector<16x8xi32>
    %cst_31 = arith.constant 0x7F800000 : f32
    %79 = vector.broadcast %cst_31 : f32 to vector<16x8xf32>
    %80 = arith.select %78, %79, %55 : vector<16x8xi1>, vector<16x8xf32>
    %81 = arith.addf %67, %10 : vector<1x8xf32>
    %cst_32 = arith.constant 0.000000e+00 : f32
    %82 = vector.broadcast %cst_32 : f32 to vector<1x8xf32>
    %83 = arith.maximumf %81, %82 : vector<1x8xf32>
    %84 = math.sqrt %83 : vector<1x8xf32>
    %c0_33 = arith.constant 0 : index
    %c2 = arith.constant 2 : index
    %c0_34 = arith.constant 0 : index
    %85 = vector.load %arg4[%c0_33, %c2, %c0_34] : memref<1x4x8xf32, #tpu.memory_space<vmem>>, vector<1x1x8xf32>
    %86 = vector.shape_cast %85 : vector<1x1x8xf32> to vector<1x8xf32>
    %87 = vector.shape_cast %84 : vector<1x8xf32> to vector<1x1x8xf32>
    tpu.vector_store %arg4[%c0_33, %c2, %c0_34], %87 {strides = array<i32>} : memref<1x4x8xf32, #tpu.memory_space<vmem>>, vector<1x1x8xf32>,
    %c0_35 = arith.constant 0 : index
    %c2_36 = arith.constant 2 : index
    %c0_37 = arith.constant 0 : index
    %88 = vector.load %arg5[%c0_35, %c2_36, %c0_37] : memref<1x4x8xi32, #tpu.memory_space<vmem>>, vector<1x1x8xi32>
    %89 = vector.shape_cast %88 : vector<1x1x8xi32> to vector<1x8xi32>
    %90 = vector.shape_cast %75 : vector<1x8xi32> to vector<1x1x8xi32>
    tpu.vector_store %arg5[%c0_35, %c2_36, %c0_37], %90 {strides = array<i32>} : memref<1x4x8xi32, #tpu.memory_space<vmem>>, vector<1x1x8xi32>,
    %cst_38 = arith.constant dense<0x7F800000> : vector<8xf32>
    %91 = vector.multi_reduction <minimumf>, %80, %cst_38 [0] : vector<16x8xf32> to vector<8xf32>
    %92 = vector.shape_cast %91 : vector<8xf32> to vector<1x8xf32>
    %93 = vector.broadcast %92 : vector<1x8xf32> to vector<16x8xf32>
    %94 = arith.cmpf ole, %80, %93 : vector<16x8xf32>
    %c16_i32_39 = arith.constant 16 : i32
    %95 = vector.shape_cast %15 : vector<16x1xi32> to vector<16x1xi32>
    %96 = vector.broadcast %95 : vector<16x1xi32> to vector<16x8xi32>
    %97 = vector.broadcast %c16_i32_39 : i32 to vector<16x8xi32>
    %98 = arith.select %94, %96, %97 : vector<16x8xi1>, vector<16x8xi32>
    %cst_40 = arith.constant dense<2147483647> : vector<8xi32>
    %99 = vector.multi_reduction <minsi>, %98, %cst_40 [0] : vector<16x8xi32> to vector<8xi32>
    %100 = vector.shape_cast %99 : vector<8xi32> to vector<1x8xi32>
    %101 = arith.addf %92, %10 : vector<1x8xf32>
    %cst_41 = arith.constant 0.000000e+00 : f32
    %102 = vector.broadcast %cst_41 : f32 to vector<1x8xf32>
    %103 = arith.maximumf %101, %102 : vector<1x8xf32>
    %104 = math.sqrt %103 : vector<1x8xf32>
    %c0_42 = arith.constant 0 : index
    %c3 = arith.constant 3 : index
    %c0_43 = arith.constant 0 : index
    %105 = vector.load %arg4[%c0_42, %c3, %c0_43] : memref<1x4x8xf32, #tpu.memory_space<vmem>>, vector<1x1x8xf32>
    %106 = vector.shape_cast %105 : vector<1x1x8xf32> to vector<1x8xf32>
    %107 = vector.shape_cast %104 : vector<1x8xf32> to vector<1x1x8xf32>
    tpu.vector_store %arg4[%c0_42, %c3, %c0_43], %107 {strides = array<i32>} : memref<1x4x8xf32, #tpu.memory_space<vmem>>, vector<1x1x8xf32>,
    %c0_44 = arith.constant 0 : index
    %c3_45 = arith.constant 3 : index
    %c0_46 = arith.constant 0 : index
    %108 = vector.load %arg5[%c0_44, %c3_45, %c0_46] : memref<1x4x8xi32, #tpu.memory_space<vmem>>, vector<1x1x8xi32>
    %109 = vector.shape_cast %108 : vector<1x1x8xi32> to vector<1x8xi32>
    %110 = vector.shape_cast %100 : vector<1x8xi32> to vector<1x1x8xi32>
    tpu.vector_store %arg5[%c0_44, %c3_45, %c0_46], %110 {strides = array<i32>} : memref<1x4x8xi32, #tpu.memory_space<vmem>>, vector<1x1x8xi32>,
    return
  }
  func.func @transform_0(%arg0: i32, %arg1: i32) -> (i32, i32, i32) {
    %c0_i32 = arith.constant 0 : i32
    %c0_i32_0 = arith.constant 0 : i32
    %c0_i32_1 = arith.constant 0 : i32
    return %arg0, %c0_i32, %c0_i32_0 : i32, i32, i32
  }
  func.func @transform_1(%arg0: i32, %arg1: i32) -> (i32, i32, i32) {
    %c0_i32 = arith.constant 0 : i32
    %c0_i32_0 = arith.constant 0 : i32
    return %arg0, %arg1, %c0_i32 : i32, i32, i32
  }
  func.func @transform_2(%arg0: i32, %arg1: i32) -> (i32, i32, i32) {
    %c0_i32 = arith.constant 0 : i32
    %c0_i32_0 = arith.constant 0 : i32
    return %arg0, %c0_i32, %arg1 : i32, i32, i32
  }
  func.func @transform_3(%arg0: i32, %arg1: i32) -> (i32, i32, i32) {
    %c0_i32 = arith.constant 0 : i32
    %c0_i32_0 = arith.constant 0 : i32
    return %arg0, %c0_i32, %arg1 : i32, i32, i32
  }
}

</mosaic_0001>

<bundles_post_ra>
// kernel: tpu_custom_call.1
= control target key start
LH: loop header
LB: loop body
LE: loop exit
PB: predicated region body
PF: predicated region fallthrough
CT: control target
= control target key end

     0   :  { %9 = vsyncpa [#allocation3], 0  ;;  %s1100_s0 = inlined_call_operand.vmem [shape: f32[2,16,4], index: 0, kind: input, shape index: {}]   ;;  %s1101_s1 = inlined_call_operand.vmem [shape: f32[2,8,4], index: 1, kind: input, shape index: {}]   ;;  %s1102_s2 = inlined_call_operand.hbm [shape: f32[2,4,8], index: 2, kind: output, shape index: {0}]   ;;  %s1103_s3 = inlined_call_operand.hbm [shape: s32[2,4,8], index: 3, kind: output, shape index: {1}]  }
   0x1   :  { %11 = vsyncpa [#allocation3 + $0x1], 0 }
   0x2   :  { %12 = vsyncpa [#allocation5], 0 }
   0x3   :  { %14 = vsyncpa [#allocation5 + $0x1], 0  ;;  %s881_s12 = smov 0   ;;  %s883_s13 = smov 0  }
   0x4   :  { %s885_s14 = smov 0   ;;  %s887_s15 = smov 0  }
   0x5   :  { %s889_s16 = smov 0   ;;  %s891_s17 = smov 0  }
   0x6 LB: > { %s651_s18 = sadd.s32 4294967295, %s857_s17   ;;  %s652_s19 = sadd.s32 4294967294, %s857_s17   ;;  %s857_s17 = sphi %s891_s17, %s20_s17   ;;  %s853_s16 = sphi %s889_s16, %s1110_s16   ;;  %s849_s15 = sphi %s887_s15, %s1109_s15   ;;  %s845_s14 = sphi %s885_s14, %s1108_s14   ;;  %s841_s13 = sphi %s883_s13, %s1107_s13   ;;  %s837_s12 = sphi %s881_s12, %s1106_s12  }
   0x7   : > { %s32_s20 = sadd.s32 1, %s853_s16  ;;  %s95_s21 = sadd.s32 1, %s845_s14 }
   0x8   : > { %p34_p0 = scmp.ge.s32.totalorder %s32_s20, 2  ;;  %p105_p1 = scmp.ne.s32.totalorder %s845_s14, %s841_s13 }
   0x9   : > { %p106_p2 = scmp.eq.s32.totalorder %s651_s18, 1  ;;  %p111_p3 = scmp.ne.s32.totalorder %s841_s13, %s837_s12 }
   0xa   : > { %s1112_s20 = smov (%p34_p0, %s32_s20), 0  ;;  %p112_p5 = scmp.eq.s32.totalorder %s652_s19, 1 }
   0xb   : > { %p921_p4 = por %p106_p2, %p105_p1  ;;  %s90_s23 = ssub.s32 %s853_s16, %s1112_s20 }
   0xc   : > { %p655_p6 = scmp.ge.s32.totalorder %s857_s17, 1  ;;  %p93_p7 = scmp.eq.s32.totalorder %s90_s23, 0 }
   0xd   : > { %p928_p8 = por %p112_p5, %p111_p3  ;;  %p176_p9 = scmp.lt.s32.totalorder %s857_s17, 3 }
   0xe   : > { %s934_s25 = scalar_select %p93_p7, %s845_s14, %s95_s21  }
   0xf   : > { %p177_p10 = pnand %p655_p6, %p176_p9 }
  0x10   : > { %p212_p11 = scmp.lt.s32.totalorder (!%p177_p10), %s849_s15, 1  ;;  %vm227_vm0 = vcmask (!%p177_p10), 31744   ;;  %vm331_vm1 = vcmask (!%p177_p10), 64512   ;;  %v328_v17 = vlaneseq (!%p177_p10)  ;;  %s967_s8 = sand.u32 (!%p177_p10), 1, %s841_s13   ;;  %vm379_vm7 = vcmask (!%p177_p10), 57344  }
  0x11   : > { %180 = sbr.rel (%p177_p10) target bundleno = 422 (0x1a6), region = 28  ;;  %s656_s9 = sshll.u32 (!%p177_p10), %s967_s8, 2 }
  0x12   : > { %v953_v21 = vshrl.u32 (!%p177_p10), %v328_v17, 7  ;;  %v364_v23 = vand.u32 (!%p177_p10), 127, %v328_v17  ;;  %s972_s10 = scalar_lea.vmem (!%p177_p10), [#allocation4], %s656_s9  ;;  %s978_s11 = scalar_lea.vmem (!%p177_p10), [#allocation2], %s656_s9 }
  0x13   : > { %s666_s18 = sshll.u32 (!%p177_p10), %s849_s15, 6  ;;  %s535_s19 = sshll.u32 (!%p177_p10), %s972_s10, 4  ;;  %s1021_s19 = int_to_ptr.vmem [resolvable:$true] %s535_s19 }
  0x14   : > { %v367_v26 = vsub.s32 (!%p177_p10), %v364_v23, %v953_v21  ;;  %v959_v31 = vadd.s32 (!%p177_p10), 8, %v953_v21  ;;  %s521_s21 = sshll.u32 (!%p177_p10), %s978_s11, 4  ;;  %s1026_s29 = scalar_lea.hbm (!%p177_p10), %s1102_s2, %s666_s18  ;;  %s1028_s21 = int_to_ptr.vmem [resolvable:$true] %s521_s21 }
  0x15   : > { %s507_s30 = scalar_lea.sflag (!%p177_p10), [#allocation5], %s967_s8  ;;  %s859_s5 = smov (!%p177_p10), [#allocation4]  }
  0x16   : > { %s751_s6 = sshll.u32 (!%p177_p10), %s859_s5, 4  ;;  %s752_s6 = int_to_ptr.vmem [resolvable:$false] %s751_s6 }
  0x17   : > { %p754_p1 = scmp.lt.s32.totalorder (!%p177_p10), %s1021_s19, %s752_s6 }
  0x18   : > { %s213_s26 = scalar_select %p212_p11, %s849_s15, 1 }
  0x1a   : > { %s660_s27 = sshll.u32 %s213_s26, 3  ;;  %s670_s28 = sshll.u32 %s213_s26, 4 }
  0x1b   : > { %s223_s4 = scalar_lea.vmem %s1101_s1, %s660_s27  ;;  %s216_s7 = scalar_lea.vmem %s1100_s0, %s670_s28 }
  0x1c   : > { %v226_v0 = vld [vmem:[%s223_s4] sm:$0xff]  ;;  %v225_v2 = vld [vmem:[%s216_s7 + $0x8] sm:$0xff]  ;;  %s1019_s27 = scalar_lea.hbm %s1103_s3, %s666_s18  ;;  %s747_s4 = scalar_lea.vmem %s1021_s19, 64 }
  0x1d   : > { %v224_v1 = vld [vmem:[%s216_s7] sm:$0xff]  ;;  %674 = vmatprep.subr.msk.mxu0 %vm227_vm0, %v226_v0  ;;  %v313_v4 = vmul.f32 %v225_v2, %v225_v2  ;;  %v320_v5 = vmul.f32 %v226_v0, %v226_v0  ;;  %p748_p12 = scmp.ne.s32.totalorder %s1021_s19, %s747_s4  ;;  %s753_s7 = scalar_lea.vmem %s752_s6, 128 }
  0x1e   : > { %676 = vmatprep.mubr.msk.f32.mxu0 %vm227_vm0, %v224_v1  ;;  %v312_v3 = vmul.f32 %v224_v1, %v224_v1  ;;  %675 = vmatpush3.xpose.msk.msra.mxu0 %vm227_vm0, %v226_v0  ;;  %p755_p2 = scmp.lt.s32.totalorder %s753_s7, %s747_s4 }
  0x1f   : > { %v321_v7 = vsel %vm227_vm0, %v320_v5, 0.0  ;;  %v317_v8 = vsel %vm227_vm0, %v313_v4, 0.0  ;;  %p749_p13 = pnand %p748_p12, %p921_p4 }
  0x20   : > { %v314_v6 = vsel %vm227_vm0, %v312_v3, 0.0  ;;  %322 = vadd.xlane.f32.xlu1 %v321_v7  ;;  %p756_p3 = por %p755_p2, %p754_p1 }
  0x21   : > { %315 = vadd.xlane.f32.xlu0 %v314_v6  ;;  %677 = vmatmul.mubr.msk.f32.vlgmr.msra.gmra.mrb[0].mxu0 %vm227_vm0, %v225_v2  ;;  %p750_p0 = pneg %p749_p13 }
  0x23   : > { %p757_p5 = pnand %p756_p3, %p750_p0 }
  0x25   : > { %318 = vadd.xlane.f32.xlu0 %v317_v8 }
  0xad   : > { %v323_v27 = vpop.xlane.xlu1 %322 }
  0xae   : > { %v316_v9 = vpop.xlane.xlu0 %315  ;;  %v956_v30 = vrot.slane %v323_v27, %v367_v26 }
  0xb2   : > { %v319_v11 = vpop.xlane.xlu0 %318 }
  0xf4   : > { %v678_v10 = vpop.f32.mrb[0].mxu0 }
  0xf5   : > { %v325_v12 = vmul.f32 2.0, %v678_v10  ;;  %v303_v13 = vpop.f32.mrb[1].mxu0 }
  0xf6   : > { %v324_v14 = vmul.f32 2.0, %v303_v13 }
  0xf7   : > { %v327_v15 = vsub.f32 %v319_v11, %v325_v12 }
  0xf8   : > { %v326_v16 = vsub.f32 %v316_v9, %v324_v14 }
  0xf9   : > { %v333_v18 = vsel %vm331_vm1, %v327_v15, inf }
  0xfa   : > { %v332_v19 = vsel %vm331_vm1, %v326_v16, inf }
  0xfb   : > { %v334_v20 = vmin.f32 %v332_v19, %v333_v18 }
  0xfd   : > { %v335_v22 = vrot.slane %v334_v20, 4 }
  0xff   : > { %v336_v24 = vmin.f32 %v334_v20, %v335_v22 }
 0x101   : > { %v337_v25 = vrot.slane %v336_v24, 2 }
 0x103   : > { %v338_v28 = vmin.f32 %v336_v24, %v337_v25 }
 0x105   : > { %v339_v29 = vrot.slane %v338_v28, 1 }
 0x107   : > { %v340_v32 = vmin.f32 %v338_v28, %v339_v29 }
 0x109   : > { %vm341_vm2 = vcmp.le.f32.partialorder %v326_v16, %v340_v32  ;;  %vm342_vm3 = vcmp.le.f32.partialorder %v327_v15, %v340_v32  ;;  %v370_v33 = vadd.f32 %v956_v30, %v340_v32 }
 0x10a   : > { %v343_v34 = vsel %vm341_vm2, %v953_v21, 16  ;;  %v344_v35 = vsel %vm342_vm3, %v959_v31, 16 }
 0x10b   : > { %v345_v36 = vsel %vm331_vm1, %v343_v34, 2147483647  ;;  %v346_v37 = vsel %vm331_vm1, %v344_v35, 2147483647  ;;  %v371_v38 = vmax.f32 %v370_v33, 0.0 }
 0x10c   : > { %vm347_vm4 = vcmp.lt.s32.totalorder %v345_v36, %v346_v37 }
 0x10d   : > { %v348_v39 = vsel %vm347_vm4, %v345_v36, %v346_v37  ;;  %739 = vrsqrt.f32 %v371_v38  ;;  %vm374_vm9 = vcmp.eq.f32.partialorder %v371_v38, inf  ;;  %v377_v48 = vand.u32 2147483648, %v371_v38 }
 0x10e   : > { %v349_v40 = vrot.slane %v348_v39, 4  ;;  %vm376_vm12 = vcmp.eq.f32.partialorder %v371_v38, 0.0 }
 0x110   : > { %vm350_vm5 = vcmp.lt.s32.totalorder %v348_v39, %v349_v40 }
 0x111   : > { %v351_v41 = vsel %vm350_vm5, %v348_v39, %v349_v40 }
 0x112   : > { %v352_v42 = vrot.slane %v351_v41, 2 }
 0x114   : > { %vm353_vm6 = vcmp.lt.s32.totalorder %v351_v41, %v352_v42 }
 0x115   : > { %v354_v43 = vsel %vm353_vm6, %v351_v41, %v352_v42 }
 0x116   : > { %v355_v44 = vrot.slane %v354_v43, 1 }
 0x117   : > { %v740_v45 = vpop.eup %739 }
 0x118   : > { %vm356_vm8 = vcmp.lt.s32.totalorder %v354_v43, %v355_v44  ;;  %v373_v46 = vmul.f32 %v740_v45, %v371_v38 }
 0x119   : > { %v357_v47 = vsel %vm356_vm8, %v354_v43, %v355_v44 }
 0x11a   : > { %vm358_vm10 = vcmp.eq.s32.totalorder %v953_v21, %v357_v47  ;;  %vm359_vm11 = vcmp.eq.s32.totalorder %v959_v31, %v357_v47  ;;  %381 = vst.msk [vmem:[%s972_s10] sm:$0x1] %vm379_vm7, %v357_v47  ;;  %v375_v49 = vsel %vm374_vm9, %v371_v38, %v373_v46 }
 0x11b   : > { %v360_v50 = vsel %vm358_vm10, inf, %v326_v16  ;;  %v361_v51 = vsel %vm359_vm11, inf, %v327_v15  ;;  %v378_v52 = vsel %vm376_vm12, %v377_v48, %v375_v49 }
 0x11c   : > { %v382_v53 = vsel %vm331_vm1, %v360_v50, inf  ;;  %v383_v54 = vsel %vm331_vm1, %v361_v51, inf  ;;  %380 = vst.msk [vmem:[%s978_s11] sm:$0x1] %vm379_vm7, %v378_v52 }
 0x11d   : > { %v384_v55 = vmin.f32 %v382_v53, %v383_v54 }
 0x11f   : > { %v385_v56 = vrot.slane %v384_v55, 4 }
 0x121   : > { %v386_v57 = vmin.f32 %v384_v55, %v385_v56 }
 0x123   : > { %v387_v58 = vrot.slane %v386_v57, 2 }
 0x125   : > { %v388_v59 = vmin.f32 %v386_v57, %v387_v58 }
 0x127   : > { %v389_v60 = vrot.slane %v388_v59, 1 }
 0x129   : > { %v390_v61 = vmin.f32 %v388_v59, %v389_v60 }
 0x12b   : > { %vm391_vm13 = vcmp.le.f32.partialorder %v360_v50, %v390_v61  ;;  %vm392_vm14 = vcmp.le.f32.partialorder %v361_v51, %v390_v61  ;;  %v412_v62 = vadd.f32 %v390_v61, %v956_v30 }
 0x12c   : > { %v393_v63 = vsel %vm391_vm13, %v953_v21, 16  ;;  %v394_v0 = vsel %vm392_vm14, %v959_v31, 16 }
 0x12d   : > { %v395_v1 = vsel %vm331_vm1, %v393_v63, 2147483647  ;;  %v396_v2 = vsel %vm331_vm1, %v394_v0, 2147483647  ;;  %v413_v3 = vmax.f32 %v412_v62, 0.0 }
 0x12e   : > { %vm397_vm15 = vcmp.lt.s32.totalorder %v395_v1, %v396_v2 }
 0x12f   : > { %v398_v4 = vsel %vm397_vm15, %v395_v1, %v396_v2  ;;  %741 = vrsqrt.f32 %v413_v3  ;;  %vm416_vm4 = vcmp.eq.f32.partialorder %v413_v3, inf  ;;  %v419_v13 = vand.u32 2147483648, %v413_v3 }
 0x130   : > { %v399_v5 = vrot.slane %v398_v4, 4  ;;  %vm418_vm8 = vcmp.eq.f32.partialorder %v413_v3, 0.0 }
 0x132   : > { %vm400_vm0 = vcmp.lt.s32.totalorder %v398_v4, %v399_v5 }
 0x133   : > { %v401_v6 = vsel %vm400_vm0, %v398_v4, %v399_v5 }
 0x134   : > { %v402_v7 = vrot.slane %v401_v6, 2 }
 0x136   : > { %vm403_vm2 = vcmp.lt.s32.totalorder %v401_v6, %v402_v7 }
 0x137   : > { %v404_v8 = vsel %vm403_vm2, %v401_v6, %v402_v7 }
 0x138   : > { %v405_v9 = vrot.slane %v404_v8, 1 }
 0x139   : > { %v742_v10 = vpop.eup %741 }
 0x13a   : > { %vm406_vm3 = vcmp.lt.s32.totalorder %v404_v8, %v405_v9  ;;  %v415_v11 = vmul.f32 %v742_v10, %v413_v3 }
 0x13b   : > { %v407_v12 = vsel %vm406_vm3, %v404_v8, %v405_v9 }
 0x13c   : > { %vm408_vm5 = vcmp.eq.s32.totalorder %v953_v21, %v407_v12  ;;  %vm409_vm6 = vcmp.eq.s32.totalorder %v959_v31, %v407_v12  ;;  %422 = vst.msk [vmem:[%s972_s10 + $0x1] sm:$0x1] %vm379_vm7, %v407_v12  ;;  %v417_v14 = vsel %vm416_vm4, %v413_v3, %v415_v11 }
 0x13d   : > { %v410_v15 = vsel %vm408_vm5, inf, %v360_v50  ;;  %v411_v16 = vsel %vm409_vm6, inf, %v361_v51  ;;  %v420_v17 = vsel %vm418_vm8, %v419_v13, %v417_v14 }
 0x13e   : > { %v423_v18 = vsel %vm331_vm1, %v410_v15, inf  ;;  %v424_v19 = vsel %vm331_vm1, %v411_v16, inf  ;;  %421 = vst.msk [vmem:[%s978_s11 + $0x1] sm:$0x1] %vm379_vm7, %v420_v17 }
 0x13f   : > { %v425_v20 = vmin.f32 %v423_v18, %v424_v19 }
 0x141   : > { %v426_v22 = vrot.slane %v425_v20, 4 }
 0x143   : > { %v427_v23 = vmin.f32 %v425_v20, %v426_v22 }
 0x145   : > { %v428_v24 = vrot.slane %v427_v23, 2 }
 0x147   : > { %v429_v25 = vmin.f32 %v427_v23, %v428_v24 }
 0x149   : > { %v430_v26 = vrot.slane %v429_v25, 1 }
 0x14b   : > { %v431_v27 = vmin.f32 %v429_v25, %v430_v26 }
 0x14d   : > { %vm432_vm9 = vcmp.le.f32.partialorder %v410_v15, %v431_v27  ;;  %vm433_vm10 = vcmp.le.f32.partialorder %v411_v16, %v431_v27  ;;  %v453_v28 = vadd.f32 %v431_v27, %v956_v30 }
 0x14e   : > { %v434_v29 = vsel %vm432_vm9, %v953_v21, 16  ;;  %v435_v32 = vsel %vm433_vm10, %v959_v31, 16 }
 0x14f   : > { %v436_v33 = vsel %vm331_vm1, %v434_v29, 2147483647  ;;  %v437_v34 = vsel %vm331_vm1, %v435_v32, 2147483647  ;;  %v454_v35 = vmax.f32 %v453_v28, 0.0 }
 0x150   : > { %vm438_vm11 = vcmp.lt.s32.totalorder %v436_v33, %v437_v34 }
 0x151   : > { %v439_v36 = vsel %vm438_vm11, %v436_v33, %v437_v34  ;;  %743 = vrsqrt.f32 %v454_v35  ;;  %vm457_vm15 = vcmp.eq.f32.partialorder %v454_v35, inf  ;;  %v460_v45 = vand.u32 2147483648, %v454_v35 }
 0x152   : > { %v440_v37 = vrot.slane %v439_v36, 4  ;;  %vm459_vm3 = vcmp.eq.f32.partialorder %v454_v35, 0.0 }
 0x154   : > { %vm441_vm12 = vcmp.lt.s32.totalorder %v439_v36, %v440_v37 }
 0x155   : > { %v442_v38 = vsel %vm441_vm12, %v439_v36, %v440_v37 }
 0x156   : > { %v443_v39 = vrot.slane %v442_v38, 2 }
 0x158   : > { %vm444_vm13 = vcmp.lt.s32.totalorder %v442_v38, %v443_v39 }
 0x159   : > { %v445_v40 = vsel %vm444_vm13, %v442_v38, %v443_v39 }
 0x15a   : > { %v446_v41 = vrot.slane %v445_v40, 1 }
 0x15b   : > { %v744_v42 = vpop.eup %743 }
 0x15c   : > { %vm447_vm14 = vcmp.lt.s32.totalorder %v445_v40, %v446_v41  ;;  %v456_v43 = vmul.f32 %v744_v42, %v454_v35 }
 0x15d   : > { %v448_v44 = vsel %vm447_vm14, %v445_v40, %v446_v41 }
 0x15e   : > { %vm449_vm0 = vcmp.eq.s32.totalorder %v953_v21, %v448_v44  ;;  %vm450_vm2 = vcmp.eq.s32.totalorder %v959_v31, %v448_v44  ;;  %463 = vst.msk [vmem:[%s972_s10 + $0x2] sm:$0x1] %vm379_vm7, %v448_v44  ;;  %v458_v46 = vsel %vm457_vm15, %v454_v35, %v456_v43 }
 0x15f   : > { %v451_v47 = vsel %vm449_vm0, inf, %v410_v15  ;;  %v452_v48 = vsel %vm450_vm2, inf, %v411_v16  ;;  %v461_v49 = vsel %vm459_vm3, %v460_v45, %v458_v46 }
 0x160   : > { %v464_v50 = vsel %vm331_vm1, %v451_v47, inf  ;;  %v465_v51 = vsel %vm331_vm1, %v452_v48, inf  ;;  %462 = vst.msk [vmem:[%s978_s11 + $0x2] sm:$0x1] %vm379_vm7, %v461_v49 }
 0x161   : > { %v466_v52 = vmin.f32 %v464_v50, %v465_v51 }
 0x163   : > { %v467_v53 = vrot.slane %v466_v52, 4 }
 0x165   : > { %v468_v54 = vmin.f32 %v466_v52, %v467_v53 }
 0x167   : > { %v469_v55 = vrot.slane %v468_v54, 2 }
 0x169   : > { %v470_v56 = vmin.f32 %v468_v54, %v469_v55 }
 0x16b   : > { %v471_v57 = vrot.slane %v470_v56, 1 }
 0x16d   : > { %v472_v58 = vmin.f32 %v470_v56, %v471_v57 }
 0x16f   : > { %vm473_vm4 = vcmp.le.f32.partialorder %v451_v47, %v472_v58  ;;  %vm474_vm5 = vcmp.le.f32.partialorder %v452_v48, %v472_v58  ;;  %v490_v59 = vadd.f32 %v472_v58, %v956_v30 }
 0x170   : > { %v475_v60 = vsel %vm473_vm4, %v953_v21, 16  ;;  %v476_v61 = vsel %vm474_vm5, %v959_v31, 16 }
 0x171   : > { %v477_v62 = vsel %vm331_vm1, %v475_v60, 2147483647  ;;  %v478_v63 = vsel %vm331_vm1, %v476_v61, 2147483647  ;;  %v491_v0 = vmax.f32 %v490_v59, 0.0 }
 0x172   : > { %vm479_vm6 = vcmp.lt.s32.totalorder %v477_v62, %v478_v63 }
 0x173   : > { %v480_v1 = vsel %vm479_vm6, %v477_v62, %v478_v63  ;;  %745 = vrsqrt.f32 %v491_v0  ;;  %vm494_vm10 = vcmp.eq.f32.partialorder %v491_v0, inf  ;;  %v497_v6 = vand.u32 2147483648, %v491_v0 }
 0x174   : > { %v481_v2 = vrot.slane %v480_v1, 4  ;;  %vm496_vm11 = vcmp.eq.f32.partialorder %v491_v0, 0.0 }
 0x176   : > { %vm482_vm8 = vcmp.lt.s32.totalorder %v480_v1, %v481_v2 }
 0x177   : > { %v483_v3 = vsel %vm482_vm8, %v480_v1, %v481_v2 }
 0x178   : > { %v484_v4 = vrot.slane %v483_v3, 2 }
 0x17a   : > { %vm485_vm9 = vcmp.lt.s32.totalorder %v483_v3, %v484_v4 }
 0x17b   : > { %v486_v30 = vsel %vm485_vm9, %v483_v3, %v484_v4 }
 0x17c   : > { %v487_v21 = vrot.slane %v486_v30, 1 }
 0x17d   : > { %v746_v31 = vpop.eup %745 }
 0x17e   : > { %v493_v5 = vmul.f32 %v746_v31, %v491_v0  ;;  %vm488_vm1 = vcmp.lt.s32.totalorder %v486_v30, %v487_v21 }
 0x17f   : > { %v489_v7 = vsel %vm488_vm1, %v486_v30, %v487_v21 }
 0x180   : > { %v495_v8 = vsel %vm494_vm10, %v491_v0, %v493_v5  ;;  %500 = vst.msk [vmem:[%s972_s10 + $0x3] sm:$0x1] %vm379_vm7, %v489_v7 }
 0x181   : > { %v498_v9 = vsel %vm496_vm11, %v497_v6, %v495_v8 }
 0x182   : > { %760 = shalt.err (!%p757_p5)
}
 0x183   : > { %s761_s9 = scalar_lea.hbm %s1019_s27, 64  ;;  %s765_s23 = scalar_lea.hbm %s1103_s3, 128 }
 0x184   : > { %p762_p6 = scmp.ne.s32.totalorder %s1019_s27, %s761_s9  ;;  %p766_p10 = scmp.lt.u32.totalorder %s1019_s27, %s1103_s3 }
 0x185   : > { %p767_p11 = scmp.lt.u32.totalorder %s765_s23, %s761_s9  ;;  %p769_p13 = scmp.lt.u32.totalorder %s761_s9, %s1019_s27 }
 0x186   : > { %p763_p7 = pnand %p762_p6, %p921_p4 }
 0x187   : > { %p768_p12 = por %p767_p11, %p766_p10 }
 0x188   : > { %p764_p9 = pneg %p763_p7 }
 0x189   : > { %p770_p0 = por %p769_p13, %p768_p12 }
 0x18b   : > { %p771_p1 = pnand %p770_p0, %p764_p9 }
 0x18d   : > { %774 = shalt.err (!%p771_p1)
}
 0x18e   : > { %680 = dma.vmem_to_hbm [thread:$0]  (%p921_p4), %s1021_s19, 64, %s1019_s27, %s507_s30   ;;  %499 = vst.msk [vmem:[%s978_s11 + $0x3] sm:$0x1] %vm379_vm7, %v498_v9 }
 0x18f   : > { %s502_s28 = scalar_lea.sflag [#allocation3], %s967_s8  ;;  %s775_s4 = scalar_lea.vmem %s1028_s21, 64 }
 0x190   : > { %p776_p2 = scmp.ne.s32.totalorder %s1028_s21, %s775_s4  ;;  %s860_s5 = smov [#allocation2]  }
 0x191   : > { %s779_s6 = sshll.u32 %s860_s5, 4  ;;  %s780_s6 = int_to_ptr.vmem [resolvable:$false] %s779_s6 }
 0x192   : > { %p777_p3 = pnand %p776_p2, %p921_p4  ;;  %s781_s7 = scalar_lea.vmem %s780_s6, 128 }
 0x193   : > { %p782_p6 = scmp.lt.s32.totalorder %s1028_s21, %s780_s6  ;;  %p783_p7 = scmp.lt.s32.totalorder %s781_s7, %s775_s4 }
 0x194   : > { %p778_p5 = pneg %p777_p3 }
 0x195   : > { %p784_p9 = por %p783_p7, %p782_p6 }
 0x197   : > { %p785_p10 = pnand %p784_p9, %p778_p5 }
 0x199   : > { %788 = shalt.err (!%p785_p10)
}
 0x19a   : > { %s789_s8 = scalar_lea.hbm %s1026_s29, 64  ;;  %s793_s27 = scalar_lea.hbm %s1102_s2, 128 }
 0x19b   : > { %p790_p11 = scmp.ne.s32.totalorder %s1026_s29, %s789_s8  ;;  %p794_p0 = scmp.lt.u32.totalorder %s1026_s29, %s1102_s2 }
 0x19c   : > { %p795_p1 = scmp.lt.u32.totalorder %s793_s27, %s789_s8  ;;  %p797_p3 = scmp.lt.u32.totalorder %s789_s8, %s1026_s29 }
 0x19d   : > { %p791_p12 = pnand %p790_p11, %p921_p4 }
 0x19e   : > { %p796_p2 = por %p795_p1, %p794_p0 }
 0x19f   : > { %p792_p13 = pneg %p791_p12 }
 0x1a0   : > { %p798_p5 = por %p797_p3, %p796_p2 }
 0x1a2   : > { %p799_p6 = pnand %p798_p5, %p792_p13 }
 0x1a4   : > { %802 = shalt.err (!%p799_p6)
}
 0x1a5   : > { %679 = dma.vmem_to_hbm [thread:$0]  (%p921_p4), %s1028_s21, 64, %s1026_s29, %s502_s28  }
 0x1a6 PF: > { %p690_p7 = scmp.ge.s32.totalorder %s857_s17, 2  ;;  %s547_s10 = sand.u32 1, %s837_s12  }
 0x1a7   : > { %s548_s18 = scalar_lea.sflag [#allocation3], %s547_s10 }
 0x1a8   : > { %p684_p9 = pnand %p690_p7, %p928_p8 }
 0x1aa   : > { %828 = dma.done.wait (!%p684_p9), %s548_s18, 64  }
 0x1ab   : > { %830 = vsyncadd (!%p684_p9), %s548_s18, 4294967232  ;;  %s557_s23 = scalar_lea.sflag [#allocation5], %s547_s10 }
 0x1ac   : > { %832 = dma.done.wait (!%p684_p9), %s557_s23, 64  }
 0x1ad   : > { %834 = vsyncadd (!%p684_p9), %s557_s23, 4294967232  ;;  %s20_s17 = sadd.s32 1, %s857_s17   ;;  %s1106_s12 = smov %s841_s13 }
 0x1ae   : > { %p17_p10 = scmp.ge.s32.totalorder %s20_s17, 4   ;;  %s1107_s13 = smov %s845_s14 }
 0x1af   : > { %s1108_s14 = smov %s934_s25  ;;  %s1109_s15 = smov %s853_s16 }
 0x1b0   : > { %s1110_s16 = smov %s1112_s20  ;;  %19 = sbr.rel (!%p17_p10) target bundleno = 6 (0x6), region = 83 }
 0x1b7   :  { %562 = vsyncpa [#allocation3], 1 }
 0x1b8   :  { %564 = vsyncpa [#allocation3 + $0x1], 1 }
 0x1b9   :  { %565 = vsyncpa [#allocation5], 1 }
 0x1ba   :  { %567 = vsyncpa [#allocation5 + $0x1], 1 }

</bundles_post_ra>
